<compile_context>
chip_gen: v5e
topology: v5e:2x2
jax: 0.10.0
libtpu: 0.0.40
codegen_flags: <defaults>
</compile_context>

<pallas_src>
import math
import functools

import jax
import jax.numpy as jnp
from jax import lax
from jax.experimental import pallas as pl
from jax.experimental.pallas import tpu as pltpu

LN_EPS = 1e-5
# -torch.finfo(torch.float32).max
MASK_VALUE = -3.4028234663852886e+38
INV_SQRT2 = 1.0 / math.sqrt(2.0)


def _layer_norm(x, gamma, beta):
    # PyTorch nn.LayerNorm over the last dim (biased variance, eps=1e-5), f32 math.
    mean = jnp.mean(x, axis=-1, keepdims=True)
    var = jnp.mean((x - mean) ** 2, axis=-1, keepdims=True)
    return (x - mean) * lax.rsqrt(var + LN_EPS) * gamma + beta


# ---------------------------------------------------------------------------
# Fused per-layer kernel: grid = (batch_tiles, depth); one step == one layer of
# one batch tile.  Activation (R, D) lives in the resident output block across
# the depth sweep of its batch tile.
# ---------------------------------------------------------------------------
def transformer_kernel(scale_ref, x_ref,
                       ag_ref, ab_ref, wqkv_ref, wo_ref, bo_ref,
                       fg_ref, fb_ref, w1_ref, b1_ref, w2_ref, b2_ref,
                       o_ref, *, Bt, N, heads, dim_head):
    d = pl.program_id(1)                 # depth axis: innermost, sequential
    inner = heads * dim_head
    R = Bt * N                           # rows in this batch tile
    G = Bt * heads                       # collapsed attention batch dim
    bf16 = jnp.bfloat16

    @pl.when(d == 0)
    def _():
        o_ref[...] = x_ref[...]          # seed the resident activation for this tile

    x = o_ref[...]                       # (R, D) f32 resident activation

    # ---------------- attention block: x <- x + to_out(LSA(LN(x))) ----------------
    xn = _layer_norm(x, ag_ref[...], ab_ref[...])                      # (R, D) f32
    qkv = jnp.dot(xn.astype(bf16), wqkv_ref[...],
                  preferred_element_type=jnp.float32)                  # (R, 3*inner) f32

    # rows -> (b, n), tokens moved to lanes via a batched minor transpose
    qkv_t = jnp.swapaxes(qkv.reshape(Bt, N, 3 * inner), -1, -2)        # (Bt, 3*inner, N)

    scale = scale_ref[d]                 # exp(temperature) for this layer
    # fold the softmax scale into q (B*N*inner muls instead of heads*B*N*N)
    q_t = qkv_t[:, 0 * inner:1 * inner, :].reshape(G, dim_head, N) * scale
    k_t = qkv_t[:, 1 * inner:2 * inner, :].reshape(G, dim_head, N)
    v_t = qkv_t[:, 2 * inner:3 * inner, :].reshape(G, dim_head, N)

    q = jnp.swapaxes(q_t, -1, -2).astype(bf16)     # (G, N, dh)
    k = k_t.astype(bf16)                           # (G, dh, N)  native MXU RHS layout
    v = jnp.swapaxes(v_t, -1, -2).astype(bf16)     # (G, N, dh)

    # all heads / batch elements in ONE batched matmul (no per-head loop)
    dots = jnp.einsum("gnd,gdm->gnm", q, k,
                      preferred_element_type=jnp.float32)              # (G, N, N) f32

    # LSA diagonal mask (built once).  MASK_VALUE - rowmax may underflow to -inf;
    # exp(-inf) == 0 which is exactly what we want here.
    row = lax.broadcasted_iota(jnp.int32, (N, N), 0)
    col = lax.broadcasted_iota(jnp.int32, (N, N), 1)
    dots = jnp.where((row == col)[None], MASK_VALUE, dots)
    dots = dots - jnp.max(dots, axis=-1, keepdims=True)
    e = jnp.exp(dots)
    attn = e * pl.reciprocal(jnp.sum(e, axis=-1, keepdims=True), approx=True)

    out = jnp.einsum("gnm,gmd->gnd", attn.astype(bf16), v,
                     preferred_element_type=jnp.float32)               # (G, N, dh) f32

    # merge heads back: (G, N, dh) -> (R, inner) with torch 'b h n d -> b n (h d)' order
    out = jnp.swapaxes(out, -1, -2).reshape(Bt, inner, N)
    attn_out = jnp.swapaxes(out, -1, -2).reshape(R, inner)

    y = jnp.dot(attn_out.astype(bf16), wo_ref[...],
                preferred_element_type=jnp.float32) + bo_ref[...]
    x = x + y                                                          # residual

    # ---------------- feed-forward block: x <- x + FFN(LN(x)) ----------------
    xn2 = _layer_norm(x, fg_ref[...], fb_ref[...])
    h1 = jnp.dot(xn2.astype(bf16), w1_ref[...],
                 preferred_element_type=jnp.float32) + b1_ref[...]
    # exact (erf-based) GELU, matching torch.nn.GELU() default
    h1 = 0.5 * h1 * (1.0 + lax.erf(h1 * INV_SQRT2))
    y2 = jnp.dot(h1.astype(bf16), w2_ref[...],
                 preferred_element_type=jnp.float32) + b2_ref[...]

    o_ref[...] = (x + y2).astype(o_ref.dtype)                          # stays resident


# ---------------------------------------------------------------------------
# Wrapper: one pallas_call over (batch_tiles, depth).
# ---------------------------------------------------------------------------
def transformer_forward(x, params, heads, dim_head, num_batch_tiles=None):
    B, N, D = x.shape
    depth = params["wqkv"].shape[0]
    inner = heads * dim_head
    H = params["w1"].shape[-1]
    BN = B * N

    # Batch-tile "parallel" grid axis (one tile per TensorCore on multi-core chips);
    # depth stays innermost + "arbitrary" (layers must run in order per tile).
    if num_batch_tiles is None:
        num_batch_tiles = 2 if (B >= 2 and B % 2 == 0) else 1
    if B % num_batch_tiles != 0:
        num_batch_tiles = 1
    Bt = B // num_batch_tiles
    R = Bt * N
    if num_batch_tiles > 1 and R % 8 != 0:       # keep row tiles sublane-aligned
        num_batch_tiles, Bt, R = 1, B, BN

    x2 = x.reshape(BN, D)                        # flatten batch*tokens for tall matmuls

    # --- explicit VMEM budget: double-buffered per-layer weights + resident
    #     activation + f32 intermediates (qkv, attn scores, h1).  On v7x (64 MiB
    #     physical) large models should shrink Bt / tile mlp_dim instead.
    w_bytes = 2 * (D * 3 * inner + inner * D + D * H + H * D)          # bf16 weights
    small_bytes = 4 * (6 * D + H + 1)
    act_bytes = 4 * R * D * 3
    interm_bytes = 4 * (R * 3 * inner + 2 * R * inner + R * H + 2 * Bt * heads * N * N)
    vmem_needed = 2 * (w_bytes + small_bytes) + act_bytes + interm_bytes
    vmem_limit = int(min(max(2 * vmem_needed, 32 * 1024 * 1024), 96 * 1024 * 1024))

    flops = depth * (2 * BN * D * 3 * inner + 4 * BN * N * inner
                     + 2 * BN * inner * D + 4 * BN * D * H)
    transcendentals = depth * (BN * H + B * heads * N * N)             # erf + exp
    bytes_accessed = num_batch_tiles * depth * (w_bytes + small_bytes) + 3 * BN * D * 4
    cost = pl.CostEstimate(flops=int(flops), transcendentals=int(transcendentals),
                           bytes_accessed=int(bytes_accessed))

    kernel = functools.partial(transformer_kernel,
                               Bt=Bt, N=N, heads=heads, dim_head=dim_head)

    out = pl.pallas_call(
        kernel,
        out_shape=jax.ShapeDtypeStruct((BN, D), x.dtype),
        grid=(num_batch_tiles, depth),
        in_specs=[
            pl.BlockSpec(memory_space=pltpu.SMEM),                       # scale (depth,)
            pl.BlockSpec((R, D), lambda b, d: (b, 0)),                   # x seed (aliased w/ out)
            pl.BlockSpec((None, 1, D), lambda b, d: (d, 0, 0)),          # attn LN gamma
            pl.BlockSpec((None, 1, D), lambda b, d: (d, 0, 0)),          # attn LN beta
            pl.BlockSpec((None, D, 3 * inner), lambda b, d: (d, 0, 0)),  # to_qkv W (bf16)
            pl.BlockSpec((None, inner, D), lambda b, d: (d, 0, 0)),      # to_out W (bf16)
            pl.BlockSpec((None, 1, D), lambda b, d: (d, 0, 0)),          # to_out b
            pl.BlockSpec((None, 1, D), lambda b, d: (d, 0, 0)),          # ff LN gamma
            pl.BlockSpec((None, 1, D), lambda b, d: (d, 0, 0)),          # ff LN beta
            pl.BlockSpec((None, D, H), lambda b, d: (d, 0, 0)),          # w1 (bf16)
            pl.BlockSpec((None, 1, H), lambda b, d: (d, 0, 0)),          # b1
            pl.BlockSpec((None, H, D), lambda b, d: (d, 0, 0)),          # w2 (bf16)
            pl.BlockSpec((None, 1, D), lambda b, d: (d, 0, 0)),          # b2
        ],
        out_specs=pl.BlockSpec((R, D), lambda b, d: (b, 0)),             # resident accumulator
        input_output_aliases={1: 0},                                     # x2 shares the out buffer
        compiler_params=pltpu.CompilerParams(
            dimension_semantics=("parallel", "arbitrary"),
            vmem_limit_bytes=vmem_limit,
        ),
        cost_estimate=cost,
    )(params["scale"], x2,
      params["a_ln_g"], params["a_ln_b"],
      params["wqkv"], params["wo"], params["bo"],
      params["f_ln_g"], params["f_ln_b"],
      params["w1"], params["b1"],
      params["w2"], params["b2"])

    return out.reshape(B, N, D)


# ---------------------------------------------------------------------------
# Deterministic parameters (stacked over depth; shapes follow the PyTorch __init__).
# Matmul weights are kept persistently in bf16 (one-time conversion).
# ---------------------------------------------------------------------------
def init_transformer_params(key, dim, depth, heads, dim_head, mlp_dim):
    inner = heads * dim_head
    temperature = math.log(dim_head ** -0.5)      # nn.Parameter init in LSA
    k1, k2, k3, k4 = jax.random.split(key, 4)
    bf16 = jnp.bfloat16
    return {
        "a_ln_g": jnp.ones((depth, 1, dim), jnp.float32),
        "a_ln_b": jnp.zeros((depth, 1, dim), jnp.float32),
        "wqkv": (0.02 * jax.random.normal(k1, (depth, dim, 3 * inner), jnp.float32)).astype(bf16),
        "wo":   (0.02 * jax.random.normal(k2, (depth, inner, dim), jnp.float32)).astype(bf16),
        "bo":   jnp.zeros((depth, 1, dim), jnp.float32),
        "scale": jnp.full((depth,), math.exp(temperature), jnp.float32),
        "f_ln_g": jnp.ones((depth, 1, dim), jnp.float32),
        "f_ln_b": jnp.zeros((depth, 1, dim), jnp.float32),
        "w1": (0.02 * jax.random.normal(k3, (depth, dim, mlp_dim), jnp.float32)).astype(bf16),
        "b1": jnp.zeros((depth, 1, mlp_dim), jnp.float32),
        "w2": (0.02 * jax.random.normal(k4, (depth, mlp_dim, dim), jnp.float32)).astype(bf16),
        "b2": jnp.zeros((depth, 1, dim), jnp.float32),
    }


# ---------------------------------------------------------------------------
# Pure-JAX f32 reference (mirrors the PyTorch forward) for the correctness check.
# Uses the same (bf16-valued) weights, upcast to f32.
# ---------------------------------------------------------------------------
def transformer_reference(x, p, heads, dim_head):
    depth = p["wqkv"].shape[0]
    inner = heads * dim_head
    B, N, _ = x.shape
    f32 = jnp.float32
    for d in range(depth):
        xn = _layer_norm(x, p["a_ln_g"][d, 0], p["a_ln_b"][d, 0])
        qkv = xn @ p["wqkv"][d].astype(f32)
        q, k, v = jnp.split(qkv, 3, axis=-1)

        def split_heads(t):
            return t.reshape(B, N, heads, dim_head).transpose(0, 2, 1, 3)
        q, k, v = map(split_heads, (q, k, v))
        dots = jnp.einsum("bhnd,bhmd->bhnm", q, k) * p["scale"][d]
        dots = jnp.where(jnp.eye(N, dtype=bool), MASK_VALUE, dots)
        attn = jax.nn.softmax(dots, axis=-1)
        out = jnp.einsum("bhnm,bhmd->bhnd", attn, v)
        out = out.transpose(0, 2, 1, 3).reshape(B, N, inner)
        x = out @ p["wo"][d].astype(f32) + p["bo"][d, 0] + x

        xn = _layer_norm(x, p["f_ln_g"][d, 0], p["f_ln_b"][d, 0])
        h = xn @ p["w1"][d].astype(f32) + p["b1"][d, 0]
        h = 0.5 * h * (1.0 + lax.erf(h * INV_SQRT2))
        x = h @ p["w2"][d].astype(f32) + p["b2"][d, 0] + x
    return x


if __name__ == "__main__":
    # Small, forward-consistent shapes.
    B, N = 2, 8
    dim, depth, heads, dim_head, mlp_dim = 32, 2, 4, 8, 64

    key = jax.random.PRNGKey(0)
    key, xkey = jax.random.split(key)
    x = jax.random.normal(xkey, (B, N, dim), jnp.float32)

    params = init_transformer_params(key, dim, depth, heads, dim_head, mlp_dim)

    fwd = jax.jit(functools.partial(transformer_forward, heads=heads, dim_head=dim_head))
    out = jax.block_until_ready(fwd(x, params))

    ref = transformer_reference(x, params, heads, dim_head)
    assert out.shape == (B, N, dim)
    max_diff = float(jnp.max(jnp.abs(out - ref)))
    # bf16 MXU operands + approx softmax reciprocal, f32 accumulation/elementwise.
    assert jnp.allclose(out, ref, atol=3e-3, rtol=3e-3), (
        "mismatch vs reference; max abs diff = %g" % max_diff)

    print("KERNEL_OK")
</pallas_src>

<mosaic_0001>
module attributes {stable_mosaic.version = 11 : i64} {
  func.func @transformer_kernel(%arg0: i32, %arg1: i32, %arg2: memref<2xf32, #tpu.memory_space<smem>>, %arg3: memref<8x32xf32, #tpu.memory_space<vmem>>, %arg4: memref<1x1x32xf32, #tpu.memory_space<vmem>>, %arg5: memref<1x1x32xf32, #tpu.memory_space<vmem>>, %arg6: memref<1x32x96xbf16, #tpu.memory_space<vmem>>, %arg7: memref<1x32x32xbf16, #tpu.memory_space<vmem>>, %arg8: memref<1x1x32xf32, #tpu.memory_space<vmem>>, %arg9: memref<1x1x32xf32, #tpu.memory_space<vmem>>, %arg10: memref<1x1x32xf32, #tpu.memory_space<vmem>>, %arg11: memref<1x32x64xbf16, #tpu.memory_space<vmem>>, %arg12: memref<1x1x64xf32, #tpu.memory_space<vmem>>, %arg13: memref<1x64x32xbf16, #tpu.memory_space<vmem>>, %arg14: memref<1x1x32xf32, #tpu.memory_space<vmem>>, %arg15: memref<8x32xf32, #tpu.memory_space<vmem>>) attributes {dimension_semantics = [#tpu.dimension_semantics<parallel>, #tpu.dimension_semantics<arbitrary>], iteration_bounds = array<i64: 2, 2>, scalar_prefetch = 0 : i64, scratch_operands = 0 : i64, tpu.core_type = #tpu.core_type<tc>, window_params = [{transform_indices = @transform_0, window_bounds = array<i64: 2>}, {transform_indices = @transform_1, window_bounds = array<i64: 8, 32>}, {transform_indices = @transform_2, window_bounds = array<i64: 1, 1, 32>}, {transform_indices = @transform_3, window_bounds = array<i64: 1, 1, 32>}, {transform_indices = @transform_4, window_bounds = array<i64: 1, 32, 96>}, {transform_indices = @transform_5, window_bounds = array<i64: 1, 32, 32>}, {transform_indices = @transform_6, window_bounds = array<i64: 1, 1, 32>}, {transform_indices = @transform_7, window_bounds = array<i64: 1, 1, 32>}, {transform_indices = @transform_8, window_bounds = array<i64: 1, 1, 32>}, {transform_indices = @transform_9, window_bounds = array<i64: 1, 32, 64>}, {transform_indices = @transform_10, window_bounds = array<i64: 1, 1, 64>}, {transform_indices = @transform_11, window_bounds = array<i64: 1, 64, 32>}, {transform_indices = @transform_12, window_bounds = array<i64: 1, 1, 32>}, {transform_indices = @transform_13, window_bounds = array<i64: 8, 32>}]} {
    %c0_i32 = arith.constant 0 : i32
    %0 = arith.cmpi eq, %arg1, %c0_i32 : i32
    %1 = arith.extui %0 : i1 to i32
    %c0_i32_0 = arith.constant 0 : i32
    %2 = arith.cmpi ne, %1, %c0_i32_0 : i32
    scf.if %2 {
      %c0_58 = arith.constant 0 : index
      %c0_59 = arith.constant 0 : index
      %137 = vector.load %arg3[%c0_58, %c0_59] : memref<8x32xf32, #tpu.memory_space<vmem>>, vector<8x32xf32>
      %c0_60 = arith.constant 0 : index
      %c0_61 = arith.constant 0 : index
      %138 = vector.load %arg15[%c0_60, %c0_61] : memref<8x32xf32, #tpu.memory_space<vmem>>, vector<8x32xf32>
      tpu.vector_store %arg15[%c0_60, %c0_61], %137 {strides = array<i32>} : memref<8x32xf32, #tpu.memory_space<vmem>>, vector<8x32xf32>,
    } else {
    }
    %c0 = arith.constant 0 : index
    %c0_1 = arith.constant 0 : index
    %3 = vector.load %arg15[%c0, %c0_1] : memref<8x32xf32, #tpu.memory_space<vmem>>, vector<8x32xf32>
    %c0_2 = arith.constant 0 : index
    %c0_3 = arith.constant 0 : index
    %c0_4 = arith.constant 0 : index
    %4 = vector.load %arg4[%c0_2, %c0_3, %c0_4] : memref<1x1x32xf32, #tpu.memory_space<vmem>>, vector<1x1x32xf32>
    %5 = vector.shape_cast %4 : vector<1x1x32xf32> to vector<1x32xf32>
    %c0_5 = arith.constant 0 : index
    %c0_6 = arith.constant 0 : index
    %c0_7 = arith.constant 0 : index
    %6 = vector.load %arg5[%c0_5, %c0_6, %c0_7] : memref<1x1x32xf32, #tpu.memory_space<vmem>>, vector<1x1x32xf32>
    %7 = vector.shape_cast %6 : vector<1x1x32xf32> to vector<1x32xf32>
    %cst = arith.constant dense<0.000000e+00> : vector<8xf32>
    %8 = vector.multi_reduction <add>, %3, %cst [1] : vector<8x32xf32> to vector<8xf32>
    %9 = vector.shape_cast %8 : vector<8xf32> to vector<8x1xf32>
    %cst_8 = arith.constant 3.200000e+01 : f32
    %10 = vector.broadcast %cst_8 : f32 to vector<8x1xf32>
    %11 = arith.divf %9, %10 : vector<8x1xf32>
    %12 = vector.broadcast %11 : vector<8x1xf32> to vector<8x32xf32>
    %13 = arith.subf %3, %12 : vector<8x32xf32>
    %14 = arith.mulf %13, %13 : vector<8x32xf32>
    %cst_9 = arith.constant dense<0.000000e+00> : vector<8xf32>
    %15 = vector.multi_reduction <add>, %14, %cst_9 [1] : vector<8x32xf32> to vector<8xf32>
    %16 = vector.shape_cast %15 : vector<8xf32> to vector<8x1xf32>
    %cst_10 = arith.constant 3.200000e+01 : f32
    %17 = vector.broadcast %cst_10 : f32 to vector<8x1xf32>
    %18 = arith.divf %16, %17 : vector<8x1xf32>
    %19 = vector.broadcast %11 : vector<8x1xf32> to vector<8x32xf32>
    %20 = arith.subf %3, %19 : vector<8x32xf32>
    %cst_11 = arith.constant 9.99999974E-6 : f32
    %21 = vector.broadcast %cst_11 : f32 to vector<8x1xf32>
    %22 = arith.addf %18, %21 : vector<8x1xf32>
    %23 = math.rsqrt %22 : vector<8x1xf32>
    %24 = vector.broadcast %23 : vector<8x1xf32> to vector<8x32xf32>
    %25 = arith.mulf %20, %24 : vector<8x32xf32>
    %26 = vector.broadcast %5 : vector<1x32xf32> to vector<8x32xf32>
    %27 = arith.mulf %25, %26 : vector<8x32xf32>
    %28 = vector.broadcast %7 : vector<1x32xf32> to vector<8x32xf32>
    %29 = arith.addf %27, %28 : vector<8x32xf32>
    %30 = arith.truncf %29 : vector<8x32xf32> to vector<8x32xbf16>
    %c0_12 = arith.constant 0 : index
    %c0_13 = arith.constant 0 : index
    %c0_14 = arith.constant 0 : index
    %31 = vector.load %arg6[%c0_12, %c0_13, %c0_14] : memref<1x32x96xbf16, #tpu.memory_space<vmem>>, vector<1x32x96xbf16>
    %32 = vector.shape_cast %31 : vector<1x32x96xbf16> to vector<32x96xbf16>
    %cst_15 = arith.constant dense<0.000000e+00> : vector<8x96xf32>
    %33 = tpu.matmul %30, %32, %cst_15 {dimension_numbers = #tpu.dot_dimension_numbers<[1], [0], [0], [1], [0, 0, 1, 1], [], []>} : vector<8x32xbf16>, vector<32x96xbf16>, vector<8x96xf32> -> vector<8x96xf32>
    %34 = vector.shape_cast %33 : vector<8x96xf32> to vector<1x8x96xf32>
    %35 = tpu.transpose %34, [0, 2, 1] : vector<1x8x96xf32> -> vector<1x96x8xf32>
    %36 = arith.index_cast %arg1 : i32 to index
    %37 = memref.load %arg2[%36] : memref<2xf32, #tpu.memory_space<smem>>
    %38 = vector.extract_strided_slice %35 {offsets = [0, 0, 0], sizes = [1, 32, 8], strides = [1, 1, 1]} : vector<1x96x8xf32> to vector<1x32x8xf32>
    %39 = vector.shape_cast %38 : vector<1x32x8xf32> to vector<4x8x8xf32>
    %40 = vector.broadcast %37 : f32 to vector<4x8x8xf32>
    %41 = arith.mulf %39, %40 : vector<4x8x8xf32>
    %42 = vector.extract_strided_slice %35 {offsets = [0, 32, 0], sizes = [1, 32, 8], strides = [1, 1, 1]} : vector<1x96x8xf32> to vector<1x32x8xf32>
    %43 = vector.shape_cast %42 : vector<1x32x8xf32> to vector<4x8x8xf32>
    %44 = vector.extract_strided_slice %35 {offsets = [0, 64, 0], sizes = [1, 32, 8], strides = [1, 1, 1]} : vector<1x96x8xf32> to vector<1x32x8xf32>
    %45 = vector.shape_cast %44 : vector<1x32x8xf32> to vector<4x8x8xf32>
    %46 = tpu.transpose %41, [0, 2, 1] : vector<4x8x8xf32> -> vector<4x8x8xf32>
    %47 = arith.truncf %46 : vector<4x8x8xf32> to vector<4x8x8xbf16>
    %48 = arith.truncf %43 : vector<4x8x8xf32> to vector<4x8x8xbf16>
    %49 = tpu.transpose %45, [0, 2, 1] : vector<4x8x8xf32> -> vector<4x8x8xf32>
    %50 = arith.truncf %49 : vector<4x8x8xf32> to vector<4x8x8xbf16>
    "tpu.trace_start"() <{level = 10 : i32, message = "gnd,gdm->gnm"}> : () -> ()
    %cst_16 = arith.constant dense<0.000000e+00> : vector<4x8x8xf32>
    %51 = tpu.matmul %47, %48, %cst_16 {dimension_numbers = #tpu.dot_dimension_numbers<[2], [1], [1], [2], [0, 0, 0, 1, 1, 2], [0], [0]>} : vector<4x8x8xbf16>, vector<4x8x8xbf16>, vector<4x8x8xf32> -> vector<4x8x8xf32>
    "tpu.trace_stop"() : () -> ()
    %52 = tpu.iota {dimensions = array<i32: 0>} : vector<8x8xi32>
    %53 = tpu.iota {dimensions = array<i32: 1>} : vector<8x8xi32>
    %54 = arith.cmpi eq, %52, %53 : vector<8x8xi32>
    %55 = vector.shape_cast %54 : vector<8x8xi1> to vector<1x8x8xi1>
    %cst_17 = arith.constant -3.40282347E+38 : f32
    %56 = vector.shape_cast %55 : vector<1x8x8xi1> to vector<1x8x8xi1>
    %57 = vector.broadcast %56 : vector<1x8x8xi1> to vector<4x8x8xi1>
    %58 = vector.broadcast %cst_17 : f32 to vector<4x8x8xf32>
    %59 = arith.select %57, %58, %51 : vector<4x8x8xi1>, vector<4x8x8xf32>
    %cst_18 = arith.constant dense<0xFF800000> : vector<4x8xf32>
    %60 = vector.multi_reduction <maximumf>, %59, %cst_18 [2] : vector<4x8x8xf32> to vector<4x8xf32>
    %61 = vector.shape_cast %60 : vector<4x8xf32> to vector<4x8x1xf32>
    %62 = vector.broadcast %61 : vector<4x8x1xf32> to vector<4x8x8xf32>
    %63 = arith.subf %59, %62 : vector<4x8x8xf32>
    %64 = math.exp %63 : vector<4x8x8xf32>
    %cst_19 = arith.constant dense<0.000000e+00> : vector<4x8xf32>
    %65 = vector.multi_reduction <add>, %64, %cst_19 [2] : vector<4x8x8xf32> to vector<4x8xf32>
    %66 = vector.shape_cast %65 : vector<4x8xf32> to vector<4x8x1xf32>
    %67 = tpu.reciprocal %66 {approx = true} : vector<4x8x1xf32> -> vector<4x8x1xf32>
    %68 = vector.broadcast %67 : vector<4x8x1xf32> to vector<4x8x8xf32>
    %69 = arith.mulf %64, %68 : vector<4x8x8xf32>
    %70 = arith.truncf %69 : vector<4x8x8xf32> to vector<4x8x8xbf16>
    "tpu.trace_start"() <{level = 10 : i32, message = "gnm,gmd->gnd"}> : () -> ()
    %cst_20 = arith.constant dense<0.000000e+00> : vector<4x8x8xf32>
    %71 = tpu.matmul %70, %50, %cst_20 {dimension_numbers = #tpu.dot_dimension_numbers<[2], [1], [1], [2], [0, 0, 0, 1, 1, 2], [0], [0]>} : vector<4x8x8xbf16>, vector<4x8x8xbf16>, vector<4x8x8xf32> -> vector<4x8x8xf32>
    "tpu.trace_stop"() : () -> ()
    %72 = tpu.transpose %71, [0, 2, 1] : vector<4x8x8xf32> -> vector<4x8x8xf32>
    %73 = vector.shape_cast %72 : vector<4x8x8xf32> to vector<1x32x8xf32>
    %74 = tpu.transpose %73, [0, 2, 1] : vector<1x32x8xf32> -> vector<1x8x32xf32>
    %75 = vector.shape_cast %74 : vector<1x8x32xf32> to vector<8x32xf32>
    %76 = arith.truncf %75 : vector<8x32xf32> to vector<8x32xbf16>
    %c0_21 = arith.constant 0 : index
    %c0_22 = arith.constant 0 : index
    %c0_23 = arith.constant 0 : index
    %77 = vector.load %arg7[%c0_21, %c0_22, %c0_23] : memref<1x32x32xbf16, #tpu.memory_space<vmem>>, vector<1x32x32xbf16>
    %78 = vector.shape_cast %77 : vector<1x32x32xbf16> to vector<32x32xbf16>
    %cst_24 = arith.constant dense<0.000000e+00> : vector<8x32xf32>
    %79 = tpu.matmul %76, %78, %cst_24 {dimension_numbers = #tpu.dot_dimension_numbers<[1], [0], [0], [1], [0, 0, 1, 1], [], []>} : vector<8x32xbf16>, vector<32x32xbf16>, vector<8x32xf32> -> vector<8x32xf32>
    %c0_25 = arith.constant 0 : index
    %c0_26 = arith.constant 0 : index
    %c0_27 = arith.constant 0 : index
    %80 = vector.load %arg8[%c0_25, %c0_26, %c0_27] : memref<1x1x32xf32, #tpu.memory_space<vmem>>, vector<1x1x32xf32>
    %81 = vector.shape_cast %80 : vector<1x1x32xf32> to vector<1x32xf32>
    %82 = vector.broadcast %81 : vector<1x32xf32> to vector<8x32xf32>
    %83 = arith.addf %79, %82 : vector<8x32xf32>
    %84 = arith.addf %3, %83 : vector<8x32xf32>
    %c0_28 = arith.constant 0 : index
    %c0_29 = arith.constant 0 : index
    %c0_30 = arith.constant 0 : index
    %85 = vector.load %arg9[%c0_28, %c0_29, %c0_30] : memref<1x1x32xf32, #tpu.memory_space<vmem>>, vector<1x1x32xf32>
    %86 = vector.shape_cast %85 : vector<1x1x32xf32> to vector<1x32xf32>
    %c0_31 = arith.constant 0 : index
    %c0_32 = arith.constant 0 : index
    %c0_33 = arith.constant 0 : index
    %87 = vector.load %arg10[%c0_31, %c0_32, %c0_33] : memref<1x1x32xf32, #tpu.memory_space<vmem>>, vector<1x1x32xf32>
    %88 = vector.shape_cast %87 : vector<1x1x32xf32> to vector<1x32xf32>
    %cst_34 = arith.constant dense<0.000000e+00> : vector<8xf32>
    %89 = vector.multi_reduction <add>, %84, %cst_34 [1] : vector<8x32xf32> to vector<8xf32>
    %90 = vector.shape_cast %89 : vector<8xf32> to vector<8x1xf32>
    %cst_35 = arith.constant 3.200000e+01 : f32
    %91 = vector.broadcast %cst_35 : f32 to vector<8x1xf32>
    %92 = arith.divf %90, %91 : vector<8x1xf32>
    %93 = vector.broadcast %92 : vector<8x1xf32> to vector<8x32xf32>
    %94 = arith.subf %84, %93 : vector<8x32xf32>
    %95 = arith.mulf %94, %94 : vector<8x32xf32>
    %cst_36 = arith.constant dense<0.000000e+00> : vector<8xf32>
    %96 = vector.multi_reduction <add>, %95, %cst_36 [1] : vector<8x32xf32> to vector<8xf32>
    %97 = vector.shape_cast %96 : vector<8xf32> to vector<8x1xf32>
    %cst_37 = arith.constant 3.200000e+01 : f32
    %98 = vector.broadcast %cst_37 : f32 to vector<8x1xf32>
    %99 = arith.divf %97, %98 : vector<8x1xf32>
    %100 = vector.broadcast %92 : vector<8x1xf32> to vector<8x32xf32>
    %101 = arith.subf %84, %100 : vector<8x32xf32>
    %cst_38 = arith.constant 9.99999974E-6 : f32
    %102 = vector.broadcast %cst_38 : f32 to vector<8x1xf32>
    %103 = arith.addf %99, %102 : vector<8x1xf32>
    %104 = math.rsqrt %103 : vector<8x1xf32>
    %105 = vector.broadcast %104 : vector<8x1xf32> to vector<8x32xf32>
    %106 = arith.mulf %101, %105 : vector<8x32xf32>
    %107 = vector.broadcast %86 : vector<1x32xf32> to vector<8x32xf32>
    %108 = arith.mulf %106, %107 : vector<8x32xf32>
    %109 = vector.broadcast %88 : vector<1x32xf32> to vector<8x32xf32>
    %110 = arith.addf %108, %109 : vector<8x32xf32>
    %111 = arith.truncf %110 : vector<8x32xf32> to vector<8x32xbf16>
    %c0_39 = arith.constant 0 : index
    %c0_40 = arith.constant 0 : index
    %c0_41 = arith.constant 0 : index
    %112 = vector.load %arg11[%c0_39, %c0_40, %c0_41] : memref<1x32x64xbf16, #tpu.memory_space<vmem>>, vector<1x32x64xbf16>
    %113 = vector.shape_cast %112 : vector<1x32x64xbf16> to vector<32x64xbf16>
    %cst_42 = arith.constant dense<0.000000e+00> : vector<8x64xf32>
    %114 = tpu.matmul %111, %113, %cst_42 {dimension_numbers = #tpu.dot_dimension_numbers<[1], [0], [0], [1], [0, 0, 1, 1], [], []>} : vector<8x32xbf16>, vector<32x64xbf16>, vector<8x64xf32> -> vector<8x64xf32>
    %c0_43 = arith.constant 0 : index
    %c0_44 = arith.constant 0 : index
    %c0_45 = arith.constant 0 : index
    %115 = vector.load %arg12[%c0_43, %c0_44, %c0_45] : memref<1x1x64xf32, #tpu.memory_space<vmem>>, vector<1x1x64xf32>
    %116 = vector.shape_cast %115 : vector<1x1x64xf32> to vector<1x64xf32>
    %117 = vector.broadcast %116 : vector<1x64xf32> to vector<8x64xf32>
    %118 = arith.addf %114, %117 : vector<8x64xf32>
    %cst_46 = arith.constant 5.000000e-01 : f32
    %119 = vector.broadcast %cst_46 : f32 to vector<8x64xf32>
    %120 = arith.mulf %119, %118 : vector<8x64xf32>
    %cst_47 = arith.constant 0.707106769 : f32
    %121 = vector.broadcast %cst_47 : f32 to vector<8x64xf32>
    %122 = arith.mulf %118, %121 : vector<8x64xf32>
    %123 = math.erf %122 : vector<8x64xf32>
    %cst_48 = arith.constant 1.000000e+00 : f32
    %124 = vector.broadcast %cst_48 : f32 to vector<8x64xf32>
    %125 = arith.addf %124, %123 : vector<8x64xf32>
    %126 = arith.mulf %120, %125 : vector<8x64xf32>
    %127 = arith.truncf %126 : vector<8x64xf32> to vector<8x64xbf16>
    %c0_49 = arith.constant 0 : index
    %c0_50 = arith.constant 0 : index
    %c0_51 = arith.constant 0 : index
    %128 = vector.load %arg13[%c0_49, %c0_50, %c0_51] : memref<1x64x32xbf16, #tpu.memory_space<vmem>>, vector<1x64x32xbf16>
    %129 = vector.shape_cast %128 : vector<1x64x32xbf16> to vector<64x32xbf16>
    %cst_52 = arith.constant dense<0.000000e+00> : vector<8x32xf32>
    %130 = tpu.matmul %127, %129, %cst_52 {dimension_numbers = #tpu.dot_dimension_numbers<[1], [0], [0], [1], [0, 0, 1, 1], [], []>} : vector<8x64xbf16>, vector<64x32xbf16>, vector<8x32xf32> -> vector<8x32xf32>
    %c0_53 = arith.constant 0 : index
    %c0_54 = arith.constant 0 : index
    %c0_55 = arith.constant 0 : index
    %131 = vector.load %arg14[%c0_53, %c0_54, %c0_55] : memref<1x1x32xf32, #tpu.memory_space<vmem>>, vector<1x1x32xf32>
    %132 = vector.shape_cast %131 : vector<1x1x32xf32> to vector<1x32xf32>
    %133 = vector.broadcast %132 : vector<1x32xf32> to vector<8x32xf32>
    %134 = arith.addf %130, %133 : vector<8x32xf32>
    %135 = arith.addf %84, %134 : vector<8x32xf32>
    %c0_56 = arith.constant 0 : index
    %c0_57 = arith.constant 0 : index
    %136 = vector.load %arg15[%c0_56, %c0_57] : memref<8x32xf32, #tpu.memory_space<vmem>>, vector<8x32xf32>
    tpu.vector_store %arg15[%c0_56, %c0_57], %135 {strides = array<i32>} : memref<8x32xf32, #tpu.memory_space<vmem>>, vector<8x32xf32>,
    return
  }
  func.func @transform_0(%arg0: i32, %arg1: i32) -> i32 {
    %c0_i32 = arith.constant 0 : i32
    %c0_i32_0 = arith.constant 0 : i32
    return %c0_i32 : i32
  }
  func.func @transform_1(%arg0: i32, %arg1: i32) -> (i32, i32) {
    %c0_i32 = arith.constant 0 : i32
    %c0_i32_0 = arith.constant 0 : i32
    return %arg0, %c0_i32 : i32, i32
  }
  func.func @transform_2(%arg0: i32, %arg1: i32) -> (i32, i32, i32) {
    %c0_i32 = arith.constant 0 : i32
    %c0_i32_0 = arith.constant 0 : i32
    %c0_i32_1 = arith.constant 0 : i32
    return %arg1, %c0_i32, %c0_i32_0 : i32, i32, i32
  }
  func.func @transform_3(%arg0: i32, %arg1: i32) -> (i32, i32, i32) {
    %c0_i32 = arith.constant 0 : i32
    %c0_i32_0 = arith.constant 0 : i32
    %c0_i32_1 = arith.constant 0 : i32
    return %arg1, %c0_i32, %c0_i32_0 : i32, i32, i32
  }
  func.func @transform_4(%arg0: i32, %arg1: i32) -> (i32, i32, i32) {
    %c0_i32 = arith.constant 0 : i32
    %c0_i32_0 = arith.constant 0 : i32
    %c0_i32_1 = arith.constant 0 : i32
    return %arg1, %c0_i32, %c0_i32_0 : i32, i32, i32
  }
  func.func @transform_5(%arg0: i32, %arg1: i32) -> (i32, i32, i32) {
    %c0_i32 = arith.constant 0 : i32
    %c0_i32_0 = arith.constant 0 : i32
    %c0_i32_1 = arith.constant 0 : i32
    return %arg1, %c0_i32, %c0_i32_0 : i32, i32, i32
  }
  func.func @transform_6(%arg0: i32, %arg1: i32) -> (i32, i32, i32) {
    %c0_i32 = arith.constant 0 : i32
    %c0_i32_0 = arith.constant 0 : i32
    %c0_i32_1 = arith.constant 0 : i32
    return %arg1, %c0_i32, %c0_i32_0 : i32, i32, i32
  }
  func.func @transform_7(%arg0: i32, %arg1: i32) -> (i32, i32, i32) {
    %c0_i32 = arith.constant 0 : i32
    %c0_i32_0 = arith.constant 0 : i32
    %c0_i32_1 = arith.constant 0 : i32
    return %arg1, %c0_i32, %c0_i32_0 : i32, i32, i32
  }
  func.func @transform_8(%arg0: i32, %arg1: i32) -> (i32, i32, i32) {
    %c0_i32 = arith.constant 0 : i32
    %c0_i32_0 = arith.constant 0 : i32
    %c0_i32_1 = arith.constant 0 : i32
    return %arg1, %c0_i32, %c0_i32_0 : i32, i32, i32
  }
  func.func @transform_9(%arg0: i32, %arg1: i32) -> (i32, i32, i32) {
    %c0_i32 = arith.constant 0 : i32
    %c0_i32_0 = arith.constant 0 : i32
    %c0_i32_1 = arith.constant 0 : i32
    return %arg1, %c0_i32, %c0_i32_0 : i32, i32, i32
  }
  func.func @transform_10(%arg0: i32, %arg1: i32) -> (i32, i32, i32) {
    %c0_i32 = arith.constant 0 : i32
    %c0_i32_0 = arith.constant 0 : i32
    %c0_i32_1 = arith.constant 0 : i32
    return %arg1, %c0_i32, %c0_i32_0 : i32, i32, i32
  }
  func.func @transform_11(%arg0: i32, %arg1: i32) -> (i32, i32, i32) {
    %c0_i32 = arith.constant 0 : i32
    %c0_i32_0 = arith.constant 0 : i32
    %c0_i32_1 = arith.constant 0 : i32
    return %arg1, %c0_i32, %c0_i32_0 : i32, i32, i32
  }
  func.func @transform_12(%arg0: i32, %arg1: i32) -> (i32, i32, i32) {
    %c0_i32 = arith.constant 0 : i32
    %c0_i32_0 = arith.constant 0 : i32
    %c0_i32_1 = arith.constant 0 : i32
    return %arg1, %c0_i32, %c0_i32_0 : i32, i32, i32
  }
  func.func @transform_13(%arg0: i32, %arg1: i32) -> (i32, i32) {
    %c0_i32 = arith.constant 0 : i32
    %c0_i32_0 = arith.constant 0 : i32
    return %arg0, %c0_i32 : i32, i32
  }
}

</mosaic_0001>

<bundles_post_ra>
// kernel: transformer_forward.1
= control target key start
LH: loop header
LB: loop body
LE: loop exit
PB: predicated region body
PF: predicated region fallthrough
CT: control target
= control target key end

     0   :  { %s2323_s0 = inlined_call_operand.vmem [shape: f32[2], index: 0, kind: input, shape index: {}]   ;;  %s2324_s1 = inlined_call_operand.vmem [shape: f32[16,32], index: 1, kind: input, shape index: {}, may-alias: {1,13}]   ;;  %s2325_s2 = inlined_call_operand.vmem [shape: f32[2,1,32], index: 2, kind: input, shape index: {}]   ;;  %s2326_s3 = inlined_call_operand.vmem [shape: f32[2,1,32], index: 3, kind: input, shape index: {}]   ;;  %s2327_s4 = inlined_call_operand.vmem [shape: bf16[2,32,96], index: 4, kind: input, shape index: {}]   ;;  %s2328_s5 = inlined_call_operand.vmem [shape: bf16[2,32,32], index: 5, kind: input, shape index: {}]   ;;  %s2329_s6 = inlined_call_operand.vmem [shape: f32[2,1,32], index: 6, kind: input, shape index: {}]   ;;  %s2330_s7 = inlined_call_operand.vmem [shape: f32[2,1,32], index: 7, kind: input, shape index: {}]   ;;  %s2331_s8 = inlined_call_operand.vmem [shape: f32[2,1,32], index: 8, kind: input, shape index: {}]   ;;  %s2332_s9 = inlined_call_operand.vmem [shape: bf16[2,32,64], index: 9, kind: input, shape index: {}]   ;;  %s2333_s10 = inlined_call_operand.vmem [shape: f32[2,1,64], index: 10, kind: input, shape index: {}]   ;;  %s2334_s11 = inlined_call_operand.vmem [shape: bf16[2,64,32], index: 11, kind: input, shape index: {}]   ;;  %s2335_s12 = inlined_call_operand.vmem [shape: f32[2,1,32], index: 12, kind: input, shape index: {}]   ;;  %s2336_s13 = inlined_call_operand.vmem [shape: f32[16,32], index: 13, kind: output, shape index: {}, may-alias: {1,13}]  }
   0x1   :  { %2342 = sst [smem:[#allocation12_spill]] %s2323_s0 }
   0x2   :  { %2343 = sst [smem:[#allocation13_spill]] %s2324_s1 }
   0x3   :  { %2344 = sst [smem:[#allocation14_spill]] %s2327_s4 }
   0x4   :  { %2345 = sst [smem:[#allocation15_spill]] %s2328_s5 }
   0x5   :  { %18 = vsyncpa [#allocation3], 0  ;;  %s2105_s25 = smov 0   ;;  %s2107_s26 = smov 0  }
   0x6   :  { %s2109_s27 = smov 0   ;;  %s2111_s28 = smov 0  }
   0x7   :  { %s2113_s29 = smov 0  }
   0x8 LB: > { %2346 = sst [smem:[#allocation5_spill]] %s2015_s25  ;;  %s1796_s30 = sadd.s32 4294967295, %s2031_s29   ;;  %s2031_s29 = sphi %s2113_s29, %s24_s29   ;;  %s2027_s28 = sphi %s2111_s28, %s2368_s28   ;;  %s2023_s27 = sphi %s2109_s27, %s2367_s27   ;;  %s2019_s26 = sphi %s2107_s26, %s2366_s26   ;;  %s2015_s25 = sphi %s2105_s25, %s2365_s25  }
   0x9   : > { %2347 = sst [smem:[#allocation6_spill]] %s2023_s27  ;;  %s33_s14 = sadd.s32 1, %s2023_s27 }
   0xa   : > { %2348 = sst [smem:[#allocation7_spill]] %s2027_s28  ;;  %p34_p0 = scmp.ge.s32.totalorder %s33_s14, 2 }
   0xb   : > { %2349 = sst [smem:[#allocation8_spill]] %s2031_s29  ;;  %s36_s15 = sadd.s32 1, %s2027_s28 }
   0xc   : > { %p1798_p1 = scmp.ge.s32.totalorder %s2031_s29, 1  ;;  %p400_p2 = scmp.lt.s32.totalorder %s2031_s29, 5 }
   0xd   : > { %s2370_s14 = smov (%p34_p0, %s33_s14), 0  ;;  %s2372_s15 = smov (!%p34_p0, %s36_s15), %s2027_s28 }
   0xe   : > { %2350 = sst [smem:[#allocation9_spill]] %s2370_s14  ;;  %p401_p3 = pnand %p1798_p1, %p400_p2 }
   0xf   : > { %p38_p4 = scmp.ge.s32.totalorder %s2372_s15, 2  ;;  %p1891_p5 = scmp.eq.s32.totalorder %s1796_s30, 0 }
  0x10   : > { %p1887_p6 = pneg %p401_p3  ;;  %s2351_s0 = sld [smem:[#allocation12_spill]] }
  0x11   : > { %s2374_s15 = smov (%p38_p4, %s2372_s15), 0  ;;  %s2033_s19 = smov [#allocation2]  }
  0x12   : > { %2352 = sst [smem:[#allocation10_spill]] %s2374_s15  ;;  %p1888_p7 = pnand %p1891_p5, %p1887_p6 }
  0x13   : > { %506 = sbr.rel (%p401_p3) target bundleno = 2487 (0x9b7), region = 72 }
  0x16   : > { %s412_s18 = sshll.u32 %s2351_s0, 4  ;;  %s413_s18 = int_to_ptr.vmem [resolvable:$true] %s412_s18 }
  0x17   : > { %1890 = dma.vmem_to_smem (!%p1888_p7), %s413_s18, 16, %s2033_s19, [#allocation3]  }
  0x18   : > { %2010 = dma.done.wait (%p1891_p5), [#allocation3], 16  }
  0x19   : > { %2012 = vsyncadd (%p1891_p5), [#allocation3], 4294967280 }
  0x1a   : > { %513 = sfence }
  0x1b   : > { %p591_p8 = scmp.lt.s32.totalorder %s2019_s26, 1  ;;  %p595_p9 = scmp.lt.s32.totalorder %s2015_s25, 1 }
  0x1c   : > { %s2353_s1 = sld [smem:[#allocation13_spill]] }
  0x1d   : > { %s2376_s26 = smov (!%p591_p8, %s2019_s26), 1  ;;  %s2354_s4 = sld [smem:[#allocation14_spill]] }
  0x1e   : > { %s2143_s20 = scalar_select %p595_p9, %s2015_s25, 1 }
  0x1f   : > { %s1803_s21 = sshll.u32 %s2376_s26, 3  ;;  %s2355_s5 = sld [smem:[#allocation15_spill]] }
  0x20   : > { %s1869_s15 = sshll.u32 %s2143_s20, 4  ;;  %s616_s18 = scalar_lea.vmem %s2330_s7, %s2143_s20 }
  0x21   : > { %s635_s0 = scalar_lea.vmem %s2335_s12, %s2143_s20  ;;  %s2201_s28 = scalar_lea.vmem %s2336_s13, %s1803_s21 }
  0x22   : > { %s594_s24 = scalar_lea.vmem %s2353_s1, %s1803_s21 }
  0x23   : > { %s2160_s27 = scalar_lea.vmem %s2354_s4, %s1869_s15  ;;  %s2182_s4 = scalar_lea.vmem %s2332_s9, %s1869_s15 }
  0x25   : > { %s2165_s25 = scalar_lea.vmem %s2355_s5, %s1869_s15  ;;  %s627_s5 = scalar_lea.vmem %s2333_s10, %s2143_s20 }
  0x26   : > { %2356 = sst [smem:[#allocation11_spill]] %s2165_s25  ;;  %s1872_s25 = sshll.u32 %s2143_s20, 5 }
  0x27   : > { %s2192_s30 = scalar_lea.vmem %s2334_s11, %s1872_s25  ;;  %s2357_s15 = sld [smem:[#allocation5_spill]] }
  0x2d   : > { %p1813_p10 = scmp.ne.s32.totalorder %s2357_s15, 0 }
  0x2f   : > { %644 = sbr.rel (%p1813_p10) target bundleno = 54 (0x36), region = 80 }
  0x34   : > { %v645_v0 = vld [vmem:[%s594_s24] sm:$0xff]  ;;  %vm646_vm0 = vcmask 261120  }
  0x35   : > { %647 = vst.msk [vmem:[%s2201_s28] sm:$0xff] %vm646_vm0, %v645_v0 }
  0x36 PF: > { %vm651_vm1 = vcmask 261120   ;;  %v2034_v3 = vmov 32.0   ;;  %v1874_v15 = vld [vmem:[%s2160_s27 + $0x8] sm:$0xff]  ;;  %v1873_v16 = vld [vmem:[%s2160_s27] sm:$0xff]  ;;  %s2358_s1 = sld [smem:[#allocation5_spill]]  ;;  %s2359_s27 = scalar_lea.vmem %s2325_s2, %s2143_s20  ;;  %vm1032_vm6 = vcmask 1043456  }
  0x37   : > { %1950 = vrcp.f32 %v2034_v3  ;;  %715 = vmatpush.bf16.msra.mxu0 %v1874_v15  ;;  %v1943_v26 = vld [vmem:[%s2359_s27] ss:$0 sm:$0xff]  ;;  %s2360_s29 = scalar_lea.vmem %s2326_s3, %s2143_s20  ;;  %vm1028_vm7 = vcmask 64512   ;;  %s2361_s22 = sld [smem:[#allocation11_spill]]  ;;  %vm1589_vm0 = vcmask 523264  }
  0x38   : > { %v1944_v29 = vld [vmem:[%s2360_s29] ss:$0 sm:$0xff]  ;;  %s2362_s16 = scalar_lea.vmem %s2329_s6, %s2143_s20  ;;  %s2363_s25 = scalar_lea.vmem %s2331_s8, %s2143_s20 }
  0x3b   : > { %716 = vmatpush.bf16.msra.mxu0 %v1873_v16 }
  0x3c   : > { %v2206_v1 = vld [vmem:[%s2201_s28] sm:$0xff]  ;;  %s754_s26 = sld [smem:[#allocation2 + %s2358_s1]] }
  0x3d   : > { %v652_v2 = vsel %vm651_vm1, %v2206_v1, 0.0  ;;  %v1951_v4 = vpop.eup %1950 }
  0x3e   : > { %653 = vadd.xlane.f32.xlu0 %v652_v2  ;;  %v656_v5 = vmul.f32 32.0, %v1951_v4  ;;  %vm660_vm2 = vweird.f32 %v1951_v4 }
  0x40   : > { %v657_v6 = vsub.f32 1.0, %v656_v5 }
  0x42   : > { %v658_v7 = vmul.f32 %v1951_v4, %v657_v6  ;;  %v755_v36 = vstv %s754_s26 }
  0x44   : > { %v659_v8 = vadd.f32 %v1951_v4, %v658_v7  ;;  %v1106_v7 = vlaneseq }
  0x46   : > { %v2210_v9 = vsel %vm660_vm2, %v1951_v4, %v659_v8  ;;  %v1107_v8 = vshrl.u32 %v1106_v7, 7 }
  0xb1   : > { %v654_v10 = vpop.xlane.xlu0 %653 }
  0xb2   : > { %v662_v11 = vmul.f32 %v2210_v9, %v654_v10  ;;  %v1109_v10 = vand.u32 127, %v1106_v7 }
  0xb4   : > { %v663_v12 = vsub.f32 %v2206_v1, %v662_v11  ;;  %vm1110_vm8 = vcmp.eq.s32.totalorder %v1107_v8, %v1109_v10 }
  0xb6   : > { %v664_v13 = vmul.f32 %v663_v12, %v663_v12 }
  0xb8   : > { %v665_v14 = vsel %vm651_vm1, %v664_v13, 0.0 }
  0xb9   : > { %666 = vadd.xlane.f32.xlu0 %v665_v14 }
 0x12c   : > { %v667_v17 = vpop.xlane.xlu0 %666 }
 0x12d   : > { %v668_v18 = vmul.f32 %v667_v17, %v2210_v9 }
 0x12f   : > { %v669_v19 = vadd.f32 1e-05, %v668_v18 }
 0x131   : > { %1952 = vrsqrt.f32 %v669_v19  ;;  %vm676_vm4 = vweird.f32 %v669_v19 }
 0x137   : > { %v1953_v20 = vpop.eup %1952 }
 0x138   : > { %v671_v21 = vmul.f32 %v1953_v20, %v669_v19  ;;  %vm677_vm3 = vweird.f32 %v1953_v20 }
 0x139   : > { %vm678_vm5 = vmor %vm676_vm4, %vm677_vm3 }
 0x13a   : > { %v672_v22 = vmul.f32 %v1953_v20, %v671_v21 }
 0x13c   : > { %v673_v23 = vmul.f32 0.5, %v672_v22 }
 0x13e   : > { %v674_v24 = vsub.f32 1.5, %v673_v23 }
 0x140   : > { %v675_v25 = vmul.f32 %v1953_v20, %v674_v24 }
 0x142   : > { %v679_v27 = vsel %vm678_vm5, %v1953_v20, %v675_v25 }
 0x143   : > { %v680_v28 = vmul.f32 %v679_v27, %v663_v12 }
 0x145   : > { %v684_v30 = vmul.f32 %v1943_v26, %v680_v28 }
 0x147   : > { %v688_v31 = vadd.f32 %v1944_v29, %v684_v30 }
 0x149   : > { %v689_v32 = vpack.c.bf16 %v688_v31, %v688_v31 }
 0x14b   : > { %1822 = vmatmul.msk.bf16.vlgmr.msra.gmra.mxu0 %vm651_vm1, %v689_v32 }
 0x1c8   : > { %v718_v33 = vpop.f32.mrf.mxu0 }
 0x1c9   : > { %722 = vxpose.xlu1.b32.start.end [1/1] (short) (narrow) %v718_v33, 96 }
 0x1d0   : > { %v720_v34 = vpop.f32.mrf.mxu0 }
 0x26d   : > { %v738_v35 = vpop.trf.xlu1 }
 0x26e   : > { %v756_v38 = vmul.f32 %v755_v36, %v738_v35 }
 0x275   : > { %v739_v37 = vpop.trf.xlu1 }
 0x276   : > { %v757_v39 = vmul.f32 %v755_v36, %v739_v37 }
 0x278   : > { %v1936_v40 = vpack.i.bf16 %v756_v38, %v757_v39 }
 0x27a   : > { %1937 = vxpose.xlu1.b32.start.end [1/1] (short) (narrow) %v1936_v40, 8 }
 0x27d   : > { %v740_v41 = vpop.trf.xlu1 }
 0x27e   : > { %v758_v42 = vmul.f32 %v755_v36, %v740_v41 }
 0x280   : > { %824 = vxpose.xlu2.b32.start.end [1/1] (short) (narrow) %v758_v42, 8 }
 0x285   : > { %v741_v43 = vpop.trf.xlu1 }
 0x286   : > { %v759_v44 = vmul.f32 %v755_v36, %v741_v43 }
 0x288   : > { %856 = vxpose.xlu2.b32.start.end [1/1] (short) (narrow) %v759_v44, 8 }
 0x28d   : > { %v742_v45 = vpop.trf.xlu1 }
 0x28e   : > { %v892_v46 = vpack.c.bf16 %v742_v45, %v742_v45 }
 0x290   : > { %v1034_v47 = vsel %vm1032_vm6, %v892_v46, 0 }
 0x291   : > { %1043 = vmatpush.bf16.msra.mxu1 %v1034_v47 }
 0x295   : > { %v743_v48 = vpop.trf.xlu1 }
 0x296   : > { %v893_v49 = vpack.c.bf16 %v743_v48, %v743_v48 }
 0x298   : > { %v1053_v50 = vsel %vm1032_vm6, %v893_v49, 0 }
 0x299   : > { %1062 = vmatpush.bf16.msra.mxu2 %v1053_v50 }
 0x29d   : > { %v744_v51 = vpop.trf.xlu1 }
 0x29e   : > { %v894_v52 = vpack.c.bf16 %v744_v51, %v744_v51 }
 0x2a0   : > { %v1072_v53 = vsel %vm1032_vm6, %v894_v52, 0 }
 0x2a1   : > { %1081 = vmatpush.bf16.msra.mxu3 %v1072_v53 }
 0x2a5   : > { %v745_v54 = vpop.trf.xlu1 }
 0x2a6   : > { %v895_v55 = vpack.c.bf16 %v745_v54, %v745_v54 }
 0x2a8   : > { %v1091_v56 = vsel %vm1032_vm6, %v895_v55, 0 }
 0x2a9   : > { %1100 = vmatpush.bf16.msrb.mxu1 %v1091_v56 }
 0x2ad   : > { %v746_v57 = vpop.trf.xlu1 }
 0x2b5   : > { %v747_v58 = vpop.trf.xlu1 }
 0x2b6   : > { %928 = vxpose.xlu1.b32.start.end [1/1] (short) (narrow) %v747_v58, 8 }
 0x2bd   : > { %v748_v59 = vpop.trf.xlu1 }
 0x2be   : > { %960 = vxpose.xlu1.b32.start.end [1/1] (short) (narrow) %v748_v59, 8 }
 0x2c5   : > { %v2234_v60 = vpop.trf.xlu1 }
 0x319   : > { %v840_v61 = vpop.trf.xlu2 }
 0x31a   : > { %v890_v62 = vpack.c.bf16 %v840_v61, %v840_v61 }
 0x31c   : > { %1825 = vmatmul.msk.bf16.vlgmr.msra.gmra.mxu3 %vm1028_vm7, %v890_v62 }
 0x31e   : > { %v1938_v63 = vpop.trf.xlu1 }
 0x31f   : > { %v1942_v0 = vunpack.i.h.bf16 %v1938_v63  ;;  %v1939_v2 = vunpack.i.l.bf16 %v1938_v63 }
 0x321   : > { %v888_v3 = vpack.c.bf16 %v1942_v0, %v1942_v0  ;;  %v889_v4 = vpack.c.bf16 %v1939_v2, %v1939_v2  ;;  %v872_v5 = vpop.trf.xlu2 }
 0x322   : > { %v891_v6 = vpack.c.bf16 %v872_v5, %v872_v5 }
 0x323   : > { %1823 = vmatmul.msk.bf16.vlgmr.msra.gmra.mxu1 %vm1028_vm7, %v888_v3  ;;  %1824 = vmatmul.msk.bf16.vlgmr.msra.gmra.mxu2 %vm1028_vm7, %v889_v4 }
 0x333   : > { %1826 = vmatmul.msk.bf16.vlgmr.msrb.gmra.mxu1 %vm1028_vm7, %v891_v6 }
 0x35a   : > { %v944_v50 = vpop.trf.xlu1 }
 0x35b   : > { %v1025_v51 = vpack.c.bf16 %v944_v50, %v944_v50  ;;  %v1946_v50 = vld [vmem:[%s616_s18] ss:$0 sm:$0xff] }
 0x35d   : > { %v1188_v52 = vsel %vm1032_vm6, %v1025_v51, 0 }
 0x35e   : > { %1197 = vmatpush.bf16.msrb.mxu3 %v1188_v52  ;;  %v1947_v52 = vld [vmem:[%s2363_s25] ss:$0 sm:$0xff] }
 0x362   : > { %v976_v53 = vpop.trf.xlu1 }
 0x363   : > { %v1026_v54 = vpack.c.bf16 %v976_v53, %v976_v53 }
 0x365   : > { %v1207_v55 = vsel %vm1032_vm6, %v1026_v54, 0 }
 0x366   : > { %1216 = vmatpush.bf16.msrb.mxu0 %v1207_v55 }
 0x39f   : > { %v1083_v11 = vpop.f32.mrf.mxu3 }
 0x3a0   : > { %v1045_v12 = vpop.f32.mrf.mxu1  ;;  %v1115_v15 = vsel %vm1110_vm8, -3.4028235e+38, %v1083_v11 }
 0x3a1   : > { %v1113_v13 = vsel %vm1110_vm8, -3.4028235e+38, %v1045_v12  ;;  %v1123_v21 = vsel %vm1028_vm7, %v1115_v15, -inf }
 0x3a2   : > { %v1117_v14 = vsel %vm1028_vm7, %v1113_v13, -inf }
 0x3a3   : > { %1118 = vmax.xlane.f32.xlu0 %v1117_v14 }
 0x3a6   : > { %v1064_v16 = vpop.f32.mrf.mxu2 }
 0x3a7   : > { %v1114_v17 = vsel %vm1110_vm8, -3.4028235e+38, %v1064_v16  ;;  %v1085_v18 = vpop.f32.mrf.mxu3 }
 0x3a8   : > { %v1047_v19 = vpop.f32.mrf.mxu1  ;;  %v1120_v20 = vsel %vm1028_vm7, %v1114_v17, -inf }
 0x3a9   : > { %1121 = vmax.xlane.f32.xlu2 %v1120_v20 }
 0x3ab   : > { %1124 = vmax.xlane.f32.xlu0 %v1123_v21 }
 0x3ae   : > { %v1066_v22 = vpop.f32.mrf.mxu2 }
 0x3b0   : > { %v1102_v23 = vpop.f32.mrf.mxu1 }
 0x3b1   : > { %v1116_v24 = vsel %vm1110_vm8, -3.4028235e+38, %v1102_v23 }
 0x3b2   : > { %v1126_v25 = vsel %vm1028_vm7, %v1116_v24, -inf }
 0x3b3   : > { %1127 = vmax.xlane.f32.xlu0 %v1126_v25  ;;  %v1875_v25 = vld [vmem:[%s2361_s22] sm:$0xff] }
 0x3b8   : > { %v1104_v26 = vpop.f32.mrf.mxu1 }
 0x3dc   : > { %896 = vxpose.xlu0.b32.start.end [1/1] (short) (narrow) %v746_v57, 8 }
 0x416   : > { %v1119_v27 = vpop.xlane.xlu0 %1118 }
 0x417   : > { %v1129_v28 = vsub.f32 %v1113_v13, %v1119_v27 }
 0x419   : > { %v1133_v29 = vmul.f32 1.442695, %v1129_v28 }
 0x41b   : > { %1954 = vpow2.f32 %v1133_v29  ;;  %v1945_v29 = vld [vmem:[%s2362_s16] ss:$0 sm:$0xff] }
 0x41c   : > { %v1122_v30 = vpop.xlane.xlu2 %1121 }
 0x41d   : > { %v1130_v31 = vsub.f32 %v1114_v17, %v1122_v30 }
 0x41e   : > { %v1125_v32 = vpop.xlane.xlu0 %1124 }
 0x41f   : > { %v1135_v33 = vmul.f32 1.442695, %v1130_v31  ;;  %v1131_v35 = vsub.f32 %v1115_v15, %v1125_v32 }
 0x421   : > { %v1955_v34 = vpop.eup %1954  ;;  %1956 = vpow2.f32 %v1135_v33  ;;  %v1137_v37 = vmul.f32 1.442695, %v1131_v35 }
 0x422   : > { %v1141_v36 = vsel %vm1028_vm7, %v1955_v34, 0.0 }
 0x423   : > { %1958 = vpow2.f32 %v1137_v37 }
 0x426   : > { %v1128_v38 = vpop.xlane.xlu0 %1127 }
 0x427   : > { %v1957_v39 = vpop.eup %1956  ;;  %v1132_v40 = vsub.f32 %v1116_v24, %v1128_v38  ;;  %v1876_v24 = vld [vmem:[%s2361_s22 + $0x8] sm:$0xff] }
 0x428   : > { %v1144_v41 = vsel %vm1028_vm7, %v1957_v39, 0.0 }
 0x429   : > { %v1139_v42 = vmul.f32 1.442695, %v1132_v40  ;;  %v1959_v43 = vpop.eup %1958  ;;  %v1878_v40 = vld [vmem:[%s2182_s4 + $0x8] sm:$0xff] }
 0x42a   : > { %v1147_v44 = vsel %vm1028_vm7, %v1959_v43, 0.0  ;;  %1501 = vmatpush.bf16.msra.mxu3 %v1878_v40 }
 0x42b   : > { %1960 = vpow2.f32 %v1139_v42 }
 0x431   : > { %v1961_v45 = vpop.eup %1960 }
 0x432   : > { %v1150_v46 = vsel %vm1028_vm7, %v1961_v45, 0.0 }
 0x44d   : > { %1142 = vadd.xlane.f32.xlu0 %v1141_v36 }
 0x455   : > { %1145 = vadd.xlane.f32.xlu0 %v1144_v41  ;;  %v1877_v41 = vld [vmem:[%s2182_s4] sm:$0xff] }
 0x456   : > { %1502 = vmatpush.bf16.msra.mxu3 %v1877_v41 }
 0x45d   : > { %1148 = vadd.xlane.f32.xlu0 %v1147_v44 }
 0x465   : > { %1151 = vadd.xlane.f32.xlu0 %v1150_v46 }
 0x480   : > { %v912_v47 = vpop.trf.xlu0 }
 0x481   : > { %v1024_v48 = vpack.c.bf16 %v912_v47, %v912_v47 }
 0x483   : > { %v1169_v49 = vsel %vm1032_vm6, %v1024_v48, 0 }
 0x484   : > { %1178 = vmatpush.bf16.msrb.mxu2 %v1169_v49 }
 0x488   : > { %1431 = vmatpush.bf16.msra.mxu2 %v1876_v24 }
 0x48c   : > { %1432 = vmatpush.bf16.msra.mxu2 %v1875_v25 }
 0x48e   : > { %992 = vxpose.xlu0.b32.start.end [1/1] (short) (narrow) %v2234_v60, 8 }
 0x4c0   : > { %v1143_v56 = vpop.xlane.xlu0 %1142 }
 0x4c1   : > { %1962 = vrcp.f32 %v1143_v56  ;;  %v1948_v56 = vld [vmem:[%s627_s5] ss:$0 sm:$0xff] }
 0x4c7   : > { %v1963_v57 = vpop.eup %1962 }
 0x4c8   : > { %v1157_v58 = vmul.f32 %v1963_v57, %v1955_v34  ;;  %v1146_v59 = vpop.xlane.xlu0 %1145 }
 0x4c9   : > { %1964 = vrcp.f32 %v1146_v59 }
 0x4ca   : > { %v1161_v60 = vpack.c.bf16 %v1157_v58, %v1157_v58 }
 0x4cc   : > { %1827 = vmatmul.msk.bf16.vlgmr.msrb.gmra.mxu2 %vm1028_vm7, %v1161_v60 }
 0x4cf   : > { %v1965_v61 = vpop.eup %1964 }
 0x4d0   : > { %v1158_v62 = vmul.f32 %v1965_v61, %v1957_v39  ;;  %v1149_v63 = vpop.xlane.xlu0 %1148 }
 0x4d1   : > { %1966 = vrcp.f32 %v1149_v63  ;;  %v1882_v63 = vld [vmem:[%s2192_s30 + $0x18] sm:$0xff] }
 0x4d2   : > { %v1162_v0 = vpack.c.bf16 %v1158_v62, %v1158_v62  ;;  %1597 = vmatpush.bf16.msra.mxu0 %v1882_v63 }
 0x4d4   : > { %1828 = vmatmul.msk.bf16.vlgmr.msrb.gmra.mxu3 %vm1028_vm7, %v1162_v0 }
 0x4d7   : > { %v1967_v2 = vpop.eup %1966 }
 0x4d8   : > { %v1159_v3 = vmul.f32 %v1967_v2, %v1959_v43  ;;  %v1152_v5 = vpop.xlane.xlu0 %1151 }
 0x4d9   : > { %1968 = vrcp.f32 %v1152_v5  ;;  %v1881_v5 = vld [vmem:[%s2192_s30 + $0x10] sm:$0xff] }
 0x4da   : > { %v1163_v4 = vpack.c.bf16 %v1159_v3, %v1159_v3  ;;  %1598 = vmatpush.bf16.msra.mxu0 %v1881_v5 }
 0x4dc   : > { %1829 = vmatmul.msk.bf16.vlgmr.msrb.gmra.mxu0 %vm1028_vm7, %v1163_v4 }
 0x4df   : > { %v1969_v6 = vpop.eup %1968 }
 0x4e0   : > { %v1160_v8 = vmul.f32 %v1969_v6, %v1961_v45 }
 0x4e2   : > { %v1164_v12 = vpack.c.bf16 %v1160_v8, %v1160_v8 }
 0x532   : > { %v1008_v7 = vpop.trf.xlu0 }
 0x533   : > { %v1027_v10 = vpack.c.bf16 %v1008_v7, %v1008_v7 }
 0x535   : > { %v1226_v11 = vsel %vm1032_vm6, %v1027_v10, 0 }
 0x536   : > { %1235 = vmatpush.bf16.msra.mxu1 %v1226_v11  ;;  %v1880_v11 = vld [vmem:[%s2192_s30 + $0x8] sm:$0xff] }
 0x537   : > { %1599 = vmatpush.bf16.msra.mxu0 %v1880_v11 }
 0x539   : > { %1830 = vmatmul.msk.bf16.vlgmr.msra.gmra.mxu1 %vm1028_vm7, %v1164_v12 }
 0x54f   : > { %v1180_v13 = vpop.f32.mrf.mxu2 }
 0x550   : > { %1241 = vxpose.xlu1.b32.start.end [1/1] (short) (narrow) %v1180_v13, 8 }
 0x557   : > { %v1182_v14 = vpop.f32.mrf.mxu2  ;;  %v1199_v15 = vpop.f32.mrf.mxu3 }
 0x558   : > { %1273 = vxpose.xlu0.b32.start.end [1/1] (short) (narrow) %v1199_v15, 8  ;;  %v1879_v15 = vld [vmem:[%s2192_s30] sm:$0xff] }
 0x559   : > { %v1218_v16 = vpop.f32.mrf.mxu0  ;;  %1600 = vmatpush.bf16.msra.mxu0 %v1879_v15 }
 0x55a   : > { %1305 = vxpose.xlu1.b32.start.end [1/1] (short) (narrow) %v1218_v16, 8 }
 0x55f   : > { %v1201_v17 = vpop.f32.mrf.mxu3 }
 0x561   : > { %v1220_v18 = vpop.f32.mrf.mxu0 }
 0x5b6   : > { %v1237_v19 = vpop.f32.mrf.mxu1 }
 0x5b7   : > { %1337 = vxpose.xlu0.b32.start.end [1/1] (short) (narrow) %v1237_v19, 8 }
 0x5be   : > { %v1239_v20 = vpop.f32.mrf.mxu1 }
 0x5f4   : > { %v1257_v21 = vpop.trf.xlu1 }
 0x5f5   : > { %1369 = vxpose.xlu2.b32.start [1/4] (short) (narrow) %v1257_v21, 8 }
 0x5fc   : > { %v1289_v22 = vpop.trf.xlu0 }
 0x5fd   : > { %1370 = vxpose.xlu2.b32.cont [2/4] (short) (narrow) %v1289_v22, 8 }
 0x5fe   : > { %v1321_v23 = vpop.trf.xlu1 }
 0x605   : > { %1371 = vxpose.xlu2.b32.cont [3/4] (short) (narrow) %v1321_v23, 8 }
 0x65b   : > { %v1353_v26 = vpop.trf.xlu0 }
 0x65c   : > { %1372 = vxpose.xlu2.b32.end [4/4] (short) (narrow) %v1353_v26, 8 }
 0x6dd   : > { %v1385_v27 = vpop.trf.xlu2 }
 0x6de   : > { %v1401_v28 = vpack.c.bf16 %v1385_v27, %v1385_v27 }
 0x6e0   : > { %1839 = vmatmul.msk.bf16.vlgmr.msra.gmra.mxu2 %vm651_vm1, %v1401_v28 }
 0x763   : > { %v1434_v30 = vpop.f32.mrf.mxu2 }
 0x764   : > { %v1435_v31 = vadd.f32 %v1945_v29, %v1434_v30 }
 0x766   : > { %v2270_v32 = vadd.f32 %v1435_v31, %v2206_v1 }
 0x768   : > { %v1441_v33 = vsel %vm651_vm1, %v2270_v32, 0.0 }
 0x769   : > { %1442 = vadd.xlane.f32.xlu1 %v1441_v33 }
 0x76b   : > { %v1436_v34 = vpop.f32.mrf.mxu2 }
 0x7dc   : > { %v1443_v35 = vpop.xlane.xlu1 %1442 }
 0x7dd   : > { %v1444_v36 = vmul.f32 %v1443_v35, %v2210_v9 }
 0x7df   : > { %v1445_v37 = vsub.f32 %v2270_v32, %v1444_v36 }
 0x7e1   : > { %v1446_v38 = vmul.f32 %v1445_v37, %v1445_v37 }
 0x7e3   : > { %v1447_v39 = vsel %vm651_vm1, %v1446_v38, 0.0 }
 0x7e4   : > { %1448 = vadd.xlane.f32.xlu0 %v1447_v39 }
 0x857   : > { %v1449_v1 = vpop.xlane.xlu0 %1448 }
 0x858   : > { %v1450_v42 = vmul.f32 %v1449_v1, %v2210_v9 }
 0x85a   : > { %v1451_v43 = vadd.f32 1e-05, %v1450_v42  ;;  %v1949_v42 = vld [vmem:[%s635_s0] ss:$0 sm:$0xff] }
 0x85c   : > { %1970 = vrsqrt.f32 %v1451_v43  ;;  %vm1458_vm10 = vweird.f32 %v1451_v43 }
 0x862   : > { %v1971_v44 = vpop.eup %1970 }
 0x863   : > { %v1453_v45 = vmul.f32 %v1971_v44, %v1451_v43  ;;  %vm1459_vm9 = vweird.f32 %v1971_v44 }
 0x864   : > { %vm1460_vm11 = vmor %vm1458_vm10, %vm1459_vm9 }
 0x865   : > { %v1454_v46 = vmul.f32 %v1971_v44, %v1453_v45 }
 0x867   : > { %v1455_v47 = vmul.f32 0.5, %v1454_v46 }
 0x869   : > { %v1456_v48 = vsub.f32 1.5, %v1455_v47 }
 0x86b   : > { %v1457_v49 = vmul.f32 %v1971_v44, %v1456_v48 }
 0x86d   : > { %v1461_v51 = vsel %vm1460_vm11, %v1971_v44, %v1457_v49 }
 0x86e   : > { %v1462_v9 = vmul.f32 %v1461_v51, %v1445_v37 }
 0x870   : > { %v1466_v53 = vmul.f32 %v1946_v50, %v1462_v9 }
 0x872   : > { %v1470_v54 = vadd.f32 %v1947_v52, %v1466_v53 }
 0x874   : > { %v1471_v55 = vpack.c.bf16 %v1470_v54, %v1470_v54 }
 0x876   : > { %1848 = vmatmul.msk.bf16.vlgmr.msra.gmra.mxu3 %vm651_vm1, %v1471_v55 }
 0x8f9   : > { %v1504_v57 = vpop.f32.mrf.mxu3 }
 0x8fa   : > { %v1505_v58 = vadd.f32 %v1948_v56, %v1504_v57 }
 0x8fc   : > { %v1509_v59 = vmul.f32 0.70710677, %v1505_v58  ;;  %v1508_v39 = vmul.f32 0.5, %v1505_v58 }
 0x8fe   : > { %v1510_v60 = vmul.f32 %v1509_v59, %v1509_v59 }
 0x900   : > { %v1511_v61 = vmin.f32 %v1510_v60, 16.0 }
 0x901   : > { %v1506_v62 = vpop.f32.mrf.mxu3 }
 0x902   : > { %v1512_v0 = vmul.f32 2.1237322e-06, %v1511_v61  ;;  %v1523_v2 = vmul.f32 3.8918573e-05, %v1511_v61 }
 0x904   : > { %v1513_v3 = vadd.f32 0.00028619796, %v1512_v0  ;;  %v1524_v4 = vadd.f32 0.001143296, %v1523_v2 }
 0x906   : > { %v1514_v6 = vmul.f32 %v1513_v3, %v1511_v61  ;;  %v1525_v7 = vmul.f32 %v1524_v4, %v1511_v61 }
 0x908   : > { %v1526_v8 = vadd.f32 0.014752088, %v1525_v7  ;;  %v1515_v10 = vadd.f32 0.0036580483, %v1514_v6 }
 0x90a   : > { %v1527_v12 = vmul.f32 %v1526_v8, %v1511_v61  ;;  %v1516_v14 = vmul.f32 %v1515_v10, %v1511_v61 }
 0x90c   : > { %v1528_v13 = vadd.f32 0.112945676, %v1527_v12  ;;  %v1517_v18 = vadd.f32 0.05243302, %v1516_v14 }
 0x90e   : > { %v1529_v16 = vmul.f32 %v1528_v13, %v1511_v61  ;;  %v1518_v21 = vmul.f32 %v1517_v18, %v1511_v61 }
 0x910   : > { %v1530_v17 = vadd.f32 0.4994258, %v1529_v16  ;;  %v1519_v22 = vadd.f32 0.18741608, %v1518_v21 }
 0x912   : > { %v1531_v19 = vmul.f32 %v1530_v17, %v1511_v61  ;;  %v1520_v24 = vmul.f32 %v1519_v22, %v1511_v61 }
 0x914   : > { %v1532_v20 = vadd.f32 1.0, %v1531_v19  ;;  %v1521_v28 = vadd.f32 1.1283791, %v1520_v24 }
 0x916   : > { %1972 = vrcp.f32 %v1532_v20  ;;  %v1544_v27 = vand.u32 2147483648, %v1532_v20  ;;  %v1542_v30 = vand.u32 2147483647, %v1532_v20  ;;  %vm1538_vm13 = vweird.f32 %v1532_v20 }
 0x917   : > { %v1522_v34 = vmul.f32 %v1521_v28, %v1509_v59 }
 0x918   : > { %v1545_v33 = vor.u32 1.1754944e-38, %v1544_v27  ;;  %vm1543_vm15 = vcmp.eq.f32.partialorder %v1542_v30, 8.507059e+37 }
 0x91c   : > { %v1973_v23 = vpop.eup %1972 }
 0x91d   : > { %v1534_v25 = vmul.f32 %v1973_v23, %v1532_v20  ;;  %vm1539_vm12 = vweird.f32 %v1973_v23 }
 0x91e   : > { %vm1540_vm14 = vmor %vm1538_vm13, %vm1539_vm12 }
 0x91f   : > { %v1535_v26 = vsub.f32 1.0, %v1534_v25 }
 0x921   : > { %v1536_v29 = vmul.f32 %v1973_v23, %v1535_v26 }
 0x923   : > { %v1537_v31 = vadd.f32 %v1973_v23, %v1536_v29 }
 0x925   : > { %v1541_v35 = vsel %vm1540_vm14, %v1973_v23, %v1537_v31 }
 0x926   : > { %v1546_v36 = vsel %vm1543_vm15, %v1545_v33, %v1541_v35 }
 0x927   : > { %v1547_v37 = vmul.f32 %v1546_v36, %v1522_v34 }
 0x929   : > { %v1849_v38 = vclamps-f32 %v1547_v37, 1.0 }
 0x92b   : > { %v1550_v40 = vadd.f32 1.0, %v1849_v38 }
 0x92d   : > { %v1551_v41 = vmul.f32 %v1550_v40, %v1508_v39 }
 0x92f   : > { %v1552_v1 = vpack.c.bf16 %v1551_v41, %v1551_v41 }
 0x931   : > { %1866 = vmatmul.msk.bf16.vlgmr.msra.gmra.mxu0 %vm1589_vm0, %v1552_v1 }
 0x9ae   : > { %v1602_v43 = vpop.f32.mrf.mxu0 }
 0x9af   : > { %v1603_v44 = vadd.f32 %v1949_v42, %v1602_v43 }
 0x9b1   : > { %v1606_v45 = vadd.f32 %v1603_v44, %v2270_v32 }
 0x9b3   : > { %1607 = vst.msk [vmem:[%s2201_s28] sm:$0xff] %vm651_vm1, %v1606_v45 }
 0x9b6   : > { %v1604_v46 = vpop.f32.mrf.mxu0 }
 0x9b7 PF: > { %s2364_s18 = sld [smem:[#allocation8_spill]] }
 0x9b8   : > { %s2365_s25 = sld [smem:[#allocation6_spill]] }
 0x9b9   : > { %s2366_s26 = sld [smem:[#allocation7_spill]] }
 0x9ba   : > { %s2367_s27 = sld [smem:[#allocation9_spill]] }
 0x9bb   : > { %s2368_s28 = sld [smem:[#allocation10_spill]] }
 0x9bd   : > { %s24_s29 = sadd.s32 1, %s2364_s18  }
 0x9be   : > { %p21_p11 = scmp.ge.s32.totalorder %s24_s29, 6  }
 0x9c0   :  { %23 = sbr.rel (!%p21_p11) target bundleno = 8 (0x8), region = 144 }
 0x9c5   :  { %1627 = vsyncpa [#allocation3], 1 }
 0x9c6   :  { %1629 = vsyncpa [#allocation3 + $0x1], 1 }

</bundles_post_ra>
